<compile_context>
chip_gen: v5e
topology: v5e:2x2
jax: 0.10.0
libtpu: 0.0.40
codegen_flags: <defaults>
</compile_context>

<pallas_src>
import functools

import jax
import jax.numpy as jnp
import numpy as np
from jax import lax
from jax.experimental import pallas as pl
from jax.experimental.pallas import tpu as pltpu

_LANE = 128


def _round_up(v: int, m: int) -> int:
    return ((v + m - 1) // m) * m


def _fused_waveform_conv_kernel(x_ref, *refs, kernels):
    """Runs the whole conv chain for one batch group, entirely in VMEM.

    x_ref       : (BT, C, L_pad)           input slab (L_pad % 128 == 0)
    refs        : (w_0, b_0, w_1, b_1, ..., o_ref, im2col_ref)
      w_i       : (C, K_i*C)               tap-major fused weights
      b_i       : (C, 1)                   f32 bias
      o_ref     : (BT, C, L_out_pad)       output slab (L_out_pad % 128 == 0)
      im2col_ref: (BT, max(K_i)*C, L_pad)  VMEM scratch
    """
    im2_ref = refs[-1]
    o_ref = refs[-2]
    wb_refs = refs[:-2]

    bt, c, l_pad = x_ref.shape
    l_out_pad = o_ref.shape[2]
    cdt = x_ref.dtype

    # Zero the scratch once per grid step so the tap-halo tail columns (which
    # are never written) read back as zeros instead of stale VMEM.
    im2_ref[...] = jnp.zeros_like(im2_ref)

    for bi in range(bt):                          # static, small (sublane fill)
        cur = x_ref[bi]                           # (C, L_pad)
        for li, k in enumerate(kernels):          # static unroll over layers
            w = wb_refs[2 * li][...]              # (C, K*C)
            b = wb_refs[2 * li + 1][...]          # (C, 1) f32
            # im2col: row j*C + ci at column l holds cur[ci, l + j].
            im2_ref[bi, 0:c, :] = cur
            for j in range(1, k):
                im2_ref[bi, j * c:(j + 1) * c, 0:l_pad - j] = cur[:, j:]
            cols = im2_ref[bi, 0:k * c, :]        # (K*C, L_pad)
            # One MXU matmul per layer, contraction = C*K, f32 accumulation.
            y = jnp.dot(w, cols, preferred_element_type=jnp.float32)
            cur = (y + b).astype(cdt)             # f32 epilogue, single cast
        o_ref[bi] = cur[:, 0:l_out_pad].astype(o_ref.dtype)


def waveform_conv_block_forward(x: jax.Array, params, *, compute_dtype=None):
    """Fused chain of 'valid' Conv1d layers.  x: (N, C, L)."""
    if not params:
        return x
    n, c, l_in = x.shape
    kernels = tuple(int(w.shape[-1]) for (w, _) in params)
    total_shrink = sum(k - 1 for k in kernels)
    l_out = l_in - total_shrink
    assert l_out > 0, "kernels larger than input length"

    cdt = jnp.dtype(compute_dtype) if compute_dtype is not None else x.dtype

    # Lane-dense slabs: pad L so loads and stores are full 128-lane vectors.
    l_pad = _round_up(l_in, _LANE)
    l_out_pad = _round_up(l_out, _LANE)           # <= l_pad

    xp = x.astype(cdt)
    if l_pad > l_in:
        xp = jnp.pad(xp, ((0, 0), (0, 0), (0, l_pad - l_in)))

    # Batch group per grid step: fill the 8 f32 sublanes when C is small.
    target_bt = max(1, 8 // c)
    bt = 1
    for d in range(min(n, target_bt), 0, -1):
        if n % d == 0:
            bt = d
            break

    # Pre-fuse weights to (C, K*C) tap-major (matches the im2col row order)
    # and biases to (C, 1) f32, so no per-tap slicing happens in the kernel.
    flat_params = []
    in_specs = [pl.BlockSpec((bt, c, l_pad), lambda i: (i, 0, 0))]
    for (w, b) in params:
        c_out, c_in, k = w.shape
        assert c_out == c and c_in == c
        w_f = jnp.transpose(jnp.asarray(w), (0, 2, 1)).reshape(c_out, k * c_in)
        flat_params.append(w_f.astype(cdt))
        flat_params.append(jnp.asarray(b).reshape(c_out, 1).astype(jnp.float32))
        in_specs.append(pl.BlockSpec((c_out, k * c_in), lambda i: (0, 0)))
        in_specs.append(pl.BlockSpec((c_out, 1), lambda i: (0, 0)))

    kernel = functools.partial(_fused_waveform_conv_kernel, kernels=kernels)

    out = pl.pallas_call(
        kernel,
        out_shape=jax.ShapeDtypeStruct((n, c, l_out_pad), x.dtype),
        grid_spec=pltpu.PrefetchScalarGridSpec(
            num_scalar_prefetch=0,
            grid=(n // bt,),
            in_specs=in_specs,
            out_specs=pl.BlockSpec((bt, c, l_out_pad), lambda i: (i, 0, 0)),
            scratch_shapes=[pltpu.VMEM((bt, max(kernels) * c, l_pad), cdt)],
        ),
        compiler_params=pltpu.CompilerParams(
            dimension_semantics=("parallel",)),
    )(xp, *flat_params)

    # Drop the lane padding down to the true valid-conv length.
    return out[:, :, :l_out]


class WaveformConvBlockPallas:
    """JAX/Pallas equivalent of the PyTorch WaveformConvBlock."""

    def __init__(self, channels: int, kernels, key: jax.Array,
                 compute_dtype=None):
        self.channels = channels
        self.kernels = tuple(kernels)
        self.compute_dtype = compute_dtype
        self.params = []
        for ks in self.kernels:
            key, kw, kb = jax.random.split(key, 3)
            fan_in = channels * ks
            bound = 1.0 / np.sqrt(fan_in)
            w = jax.random.uniform(kw, (channels, channels, ks),
                                   dtype=jnp.float32, minval=-bound, maxval=bound)
            b = jax.random.uniform(kb, (channels,),
                                   dtype=jnp.float32, minval=-bound, maxval=bound)
            self.params.append((w, b))

    def __call__(self, x: jax.Array) -> jax.Array:
        return waveform_conv_block_forward(x, self.params,
                                           compute_dtype=self.compute_dtype)


def _reference_forward(x, params):
    """Pure-JAX reference (lax conv) for the correctness check."""
    for w, b in params:
        x = lax.conv_general_dilated(
            x, w, window_strides=(1,), padding="VALID",
            dimension_numbers=("NCH", "OIH", "NCH"))
        x = x + b[None, :, None]
    return x


if __name__ == "__main__":
    key = jax.random.PRNGKey(0)
    k_mod, k_x = jax.random.split(key)

    batch, channels, length = 2, 4, 32
    kernels = (3, 5)

    module = WaveformConvBlockPallas(channels, kernels, k_mod)
    x = jax.random.normal(k_x, (batch, channels, length), dtype=jnp.float32)

    out = jax.block_until_ready(module(x))

    ref = _reference_forward(x, module.params)
    np.testing.assert_allclose(np.asarray(out), np.asarray(ref),
                               rtol=1e-5, atol=1e-5)
    assert out.shape == (batch, channels, length - sum(k - 1 for k in kernels))

    print("KERNEL_OK")
</pallas_src>

<mosaic_0001>
module attributes {stable_mosaic.version = 11 : i64} {
  func.func @_fused_waveform_conv_kernel(%arg0: i32, %arg1: memref<2x4x128xf32, #tpu.memory_space<vmem>>, %arg2: memref<4x12xf32, #tpu.memory_space<vmem>>, %arg3: memref<4x1xf32, #tpu.memory_space<vmem>>, %arg4: memref<4x20xf32, #tpu.memory_space<vmem>>, %arg5: memref<4x1xf32, #tpu.memory_space<vmem>>, %arg6: memref<2x4x128xf32, #tpu.memory_space<vmem>>, %arg7: memref<2x20x128xf32, #tpu.memory_space<vmem>>) attributes {dimension_semantics = [#tpu.dimension_semantics<parallel>], iteration_bounds = array<i64: 1>, scalar_prefetch = 0 : i64, scratch_operands = 1 : i64, tpu.core_type = #tpu.core_type<tc>, window_params = [{transform_indices = @transform_0, window_bounds = array<i64: 2, 4, 128>}, {pipeline_mode = #tpu.pipeline_mode<synchronous>, transform_indices = @transform_1, window_bounds = array<i64: 4, 12>}, {pipeline_mode = #tpu.pipeline_mode<synchronous>, transform_indices = @transform_2, window_bounds = array<i64: 4, 1>}, {pipeline_mode = #tpu.pipeline_mode<synchronous>, transform_indices = @transform_3, window_bounds = array<i64: 4, 20>}, {pipeline_mode = #tpu.pipeline_mode<synchronous>, transform_indices = @transform_4, window_bounds = array<i64: 4, 1>}, {transform_indices = @transform_5, window_bounds = array<i64: 2, 4, 128>}]} {
    %cst = arith.constant 0.000000e+00 : f32
    %0 = vector.broadcast %cst : f32 to vector<2x20x128xf32>
    %c0 = arith.constant 0 : index
    %c0_0 = arith.constant 0 : index
    %c0_1 = arith.constant 0 : index
    %1 = vector.load %arg7[%c0, %c0_0, %c0_1] : memref<2x20x128xf32, #tpu.memory_space<vmem>>, vector<2x20x128xf32>
    tpu.vector_store %arg7[%c0, %c0_0, %c0_1], %0 {strides = array<i32>} : memref<2x20x128xf32, #tpu.memory_space<vmem>>, vector<2x20x128xf32>,
    %c0_2 = arith.constant 0 : index
    %c0_3 = arith.constant 0 : index
    %c0_4 = arith.constant 0 : index
    %2 = vector.load %arg1[%c0_2, %c0_3, %c0_4] : memref<2x4x128xf32, #tpu.memory_space<vmem>>, vector<1x4x128xf32>
    %3 = vector.shape_cast %2 : vector<1x4x128xf32> to vector<4x128xf32>
    %c0_5 = arith.constant 0 : index
    %c0_6 = arith.constant 0 : index
    %4 = vector.load %arg2[%c0_5, %c0_6] : memref<4x12xf32, #tpu.memory_space<vmem>>, vector<4x12xf32>
    %c0_7 = arith.constant 0 : index
    %c0_8 = arith.constant 0 : index
    %5 = vector.load %arg3[%c0_7, %c0_8] : memref<4x1xf32, #tpu.memory_space<vmem>>, vector<4x1xf32>
    %c0_9 = arith.constant 0 : index
    %c0_10 = arith.constant 0 : index
    %c0_11 = arith.constant 0 : index
    %6 = vector.load %arg7[%c0_9, %c0_10, %c0_11] : memref<2x20x128xf32, #tpu.memory_space<vmem>>, vector<1x4x128xf32>
    %7 = vector.shape_cast %6 : vector<1x4x128xf32> to vector<4x128xf32>
    %8 = vector.shape_cast %3 : vector<4x128xf32> to vector<1x4x128xf32>
    tpu.vector_store %arg7[%c0_9, %c0_10, %c0_11], %8 {strides = array<i32>} : memref<2x20x128xf32, #tpu.memory_space<vmem>>, vector<1x4x128xf32>,
    %9 = vector.extract_strided_slice %3 {offsets = [0, 1], sizes = [4, 127], strides = [1, 1]} : vector<4x128xf32> to vector<4x127xf32>
    %c0_12 = arith.constant 0 : index
    %c4 = arith.constant 4 : index
    %c0_13 = arith.constant 0 : index
    %10 = vector.load %arg7[%c0_12, %c4, %c0_13] : memref<2x20x128xf32, #tpu.memory_space<vmem>>, vector<1x4x127xf32>
    %11 = vector.shape_cast %10 : vector<1x4x127xf32> to vector<4x127xf32>
    %12 = vector.shape_cast %9 : vector<4x127xf32> to vector<1x4x127xf32>
    tpu.vector_store %arg7[%c0_12, %c4, %c0_13], %12 {strides = array<i32>} : memref<2x20x128xf32, #tpu.memory_space<vmem>>, vector<1x4x127xf32>,
    %13 = vector.extract_strided_slice %3 {offsets = [0, 2], sizes = [4, 126], strides = [1, 1]} : vector<4x128xf32> to vector<4x126xf32>
    %c0_14 = arith.constant 0 : index
    %c8 = arith.constant 8 : index
    %c0_15 = arith.constant 0 : index
    %14 = vector.load %arg7[%c0_14, %c8, %c0_15] : memref<2x20x128xf32, #tpu.memory_space<vmem>>, vector<1x4x126xf32>
    %15 = vector.shape_cast %14 : vector<1x4x126xf32> to vector<4x126xf32>
    %16 = vector.shape_cast %13 : vector<4x126xf32> to vector<1x4x126xf32>
    tpu.vector_store %arg7[%c0_14, %c8, %c0_15], %16 {strides = array<i32>} : memref<2x20x128xf32, #tpu.memory_space<vmem>>, vector<1x4x126xf32>,
    %c0_16 = arith.constant 0 : index
    %c0_17 = arith.constant 0 : index
    %c0_18 = arith.constant 0 : index
    %17 = vector.load %arg7[%c0_16, %c0_17, %c0_18] : memref<2x20x128xf32, #tpu.memory_space<vmem>>, vector<1x12x128xf32>
    %18 = vector.shape_cast %17 : vector<1x12x128xf32> to vector<12x128xf32>
    %cst_19 = arith.constant dense<0.000000e+00> : vector<4x128xf32>
    %19 = tpu.matmul %4, %18, %cst_19 {dimension_numbers = #tpu.dot_dimension_numbers<[1], [0], [0], [1], [0, 0, 1, 1], [], []>} : vector<4x12xf32>, vector<12x128xf32>, vector<4x128xf32> -> vector<4x128xf32>
    %20 = vector.broadcast %5 : vector<4x1xf32> to vector<4x128xf32>
    %21 = arith.addf %19, %20 : vector<4x128xf32>
    %c0_20 = arith.constant 0 : index
    %c0_21 = arith.constant 0 : index
    %22 = vector.load %arg4[%c0_20, %c0_21] : memref<4x20xf32, #tpu.memory_space<vmem>>, vector<4x20xf32>
    %c0_22 = arith.constant 0 : index
    %c0_23 = arith.constant 0 : index
    %23 = vector.load %arg5[%c0_22, %c0_23] : memref<4x1xf32, #tpu.memory_space<vmem>>, vector<4x1xf32>
    %c0_24 = arith.constant 0 : index
    %c0_25 = arith.constant 0 : index
    %c0_26 = arith.constant 0 : index
    %24 = vector.load %arg7[%c0_24, %c0_25, %c0_26] : memref<2x20x128xf32, #tpu.memory_space<vmem>>, vector<1x4x128xf32>
    %25 = vector.shape_cast %24 : vector<1x4x128xf32> to vector<4x128xf32>
    %26 = vector.shape_cast %21 : vector<4x128xf32> to vector<1x4x128xf32>
    tpu.vector_store %arg7[%c0_24, %c0_25, %c0_26], %26 {strides = array<i32>} : memref<2x20x128xf32, #tpu.memory_space<vmem>>, vector<1x4x128xf32>,
    %27 = vector.extract_strided_slice %21 {offsets = [0, 1], sizes = [4, 127], strides = [1, 1]} : vector<4x128xf32> to vector<4x127xf32>
    %c0_27 = arith.constant 0 : index
    %c4_28 = arith.constant 4 : index
    %c0_29 = arith.constant 0 : index
    %28 = vector.load %arg7[%c0_27, %c4_28, %c0_29] : memref<2x20x128xf32, #tpu.memory_space<vmem>>, vector<1x4x127xf32>
    %29 = vector.shape_cast %28 : vector<1x4x127xf32> to vector<4x127xf32>
    %30 = vector.shape_cast %27 : vector<4x127xf32> to vector<1x4x127xf32>
    tpu.vector_store %arg7[%c0_27, %c4_28, %c0_29], %30 {strides = array<i32>} : memref<2x20x128xf32, #tpu.memory_space<vmem>>, vector<1x4x127xf32>,
    %31 = vector.extract_strided_slice %21 {offsets = [0, 2], sizes = [4, 126], strides = [1, 1]} : vector<4x128xf32> to vector<4x126xf32>
    %c0_30 = arith.constant 0 : index
    %c8_31 = arith.constant 8 : index
    %c0_32 = arith.constant 0 : index
    %32 = vector.load %arg7[%c0_30, %c8_31, %c0_32] : memref<2x20x128xf32, #tpu.memory_space<vmem>>, vector<1x4x126xf32>
    %33 = vector.shape_cast %32 : vector<1x4x126xf32> to vector<4x126xf32>
    %34 = vector.shape_cast %31 : vector<4x126xf32> to vector<1x4x126xf32>
    tpu.vector_store %arg7[%c0_30, %c8_31, %c0_32], %34 {strides = array<i32>} : memref<2x20x128xf32, #tpu.memory_space<vmem>>, vector<1x4x126xf32>,
    %35 = vector.extract_strided_slice %21 {offsets = [0, 3], sizes = [4, 125], strides = [1, 1]} : vector<4x128xf32> to vector<4x125xf32>
    %c0_33 = arith.constant 0 : index
    %c12 = arith.constant 12 : index
    %c0_34 = arith.constant 0 : index
    %36 = vector.load %arg7[%c0_33, %c12, %c0_34] : memref<2x20x128xf32, #tpu.memory_space<vmem>>, vector<1x4x125xf32>
    %37 = vector.shape_cast %36 : vector<1x4x125xf32> to vector<4x125xf32>
    %38 = vector.shape_cast %35 : vector<4x125xf32> to vector<1x4x125xf32>
    tpu.vector_store %arg7[%c0_33, %c12, %c0_34], %38 {strides = array<i32>} : memref<2x20x128xf32, #tpu.memory_space<vmem>>, vector<1x4x125xf32>,
    %39 = vector.extract_strided_slice %21 {offsets = [0, 4], sizes = [4, 124], strides = [1, 1]} : vector<4x128xf32> to vector<4x124xf32>
    %c0_35 = arith.constant 0 : index
    %c16 = arith.constant 16 : index
    %c0_36 = arith.constant 0 : index
    %40 = vector.load %arg7[%c0_35, %c16, %c0_36] : memref<2x20x128xf32, #tpu.memory_space<vmem>>, vector<1x4x124xf32>
    %41 = vector.shape_cast %40 : vector<1x4x124xf32> to vector<4x124xf32>
    %42 = vector.shape_cast %39 : vector<4x124xf32> to vector<1x4x124xf32>
    tpu.vector_store %arg7[%c0_35, %c16, %c0_36], %42 {strides = array<i32>} : memref<2x20x128xf32, #tpu.memory_space<vmem>>, vector<1x4x124xf32>,
    %c0_37 = arith.constant 0 : index
    %c0_38 = arith.constant 0 : index
    %c0_39 = arith.constant 0 : index
    %43 = vector.load %arg7[%c0_37, %c0_38, %c0_39] : memref<2x20x128xf32, #tpu.memory_space<vmem>>, vector<1x20x128xf32>
    %44 = vector.shape_cast %43 : vector<1x20x128xf32> to vector<20x128xf32>
    %cst_40 = arith.constant dense<0.000000e+00> : vector<4x128xf32>
    %45 = tpu.matmul %22, %44, %cst_40 {dimension_numbers = #tpu.dot_dimension_numbers<[1], [0], [0], [1], [0, 0, 1, 1], [], []>} : vector<4x20xf32>, vector<20x128xf32>, vector<4x128xf32> -> vector<4x128xf32>
    %46 = vector.broadcast %23 : vector<4x1xf32> to vector<4x128xf32>
    %47 = arith.addf %45, %46 : vector<4x128xf32>
    %c0_41 = arith.constant 0 : index
    %c0_42 = arith.constant 0 : index
    %c0_43 = arith.constant 0 : index
    %48 = vector.load %arg6[%c0_41, %c0_42, %c0_43] : memref<2x4x128xf32, #tpu.memory_space<vmem>>, vector<1x4x128xf32>
    %49 = vector.shape_cast %48 : vector<1x4x128xf32> to vector<4x128xf32>
    %50 = vector.shape_cast %47 : vector<4x128xf32> to vector<1x4x128xf32>
    tpu.vector_store %arg6[%c0_41, %c0_42, %c0_43], %50 {strides = array<i32>} : memref<2x4x128xf32, #tpu.memory_space<vmem>>, vector<1x4x128xf32>,
    %c1 = arith.constant 1 : index
    %c0_44 = arith.constant 0 : index
    %c0_45 = arith.constant 0 : index
    %51 = vector.load %arg1[%c1, %c0_44, %c0_45] : memref<2x4x128xf32, #tpu.memory_space<vmem>>, vector<1x4x128xf32>
    %52 = vector.shape_cast %51 : vector<1x4x128xf32> to vector<4x128xf32>
    %c0_46 = arith.constant 0 : index
    %c0_47 = arith.constant 0 : index
    %53 = vector.load %arg2[%c0_46, %c0_47] : memref<4x12xf32, #tpu.memory_space<vmem>>, vector<4x12xf32>
    %c0_48 = arith.constant 0 : index
    %c0_49 = arith.constant 0 : index
    %54 = vector.load %arg3[%c0_48, %c0_49] : memref<4x1xf32, #tpu.memory_space<vmem>>, vector<4x1xf32>
    %c1_50 = arith.constant 1 : index
    %c0_51 = arith.constant 0 : index
    %c0_52 = arith.constant 0 : index
    %55 = vector.load %arg7[%c1_50, %c0_51, %c0_52] : memref<2x20x128xf32, #tpu.memory_space<vmem>>, vector<1x4x128xf32>
    %56 = vector.shape_cast %55 : vector<1x4x128xf32> to vector<4x128xf32>
    %57 = vector.shape_cast %52 : vector<4x128xf32> to vector<1x4x128xf32>
    tpu.vector_store %arg7[%c1_50, %c0_51, %c0_52], %57 {strides = array<i32>} : memref<2x20x128xf32, #tpu.memory_space<vmem>>, vector<1x4x128xf32>,
    %58 = vector.extract_strided_slice %52 {offsets = [0, 1], sizes = [4, 127], strides = [1, 1]} : vector<4x128xf32> to vector<4x127xf32>
    %c1_53 = arith.constant 1 : index
    %c4_54 = arith.constant 4 : index
    %c0_55 = arith.constant 0 : index
    %59 = vector.load %arg7[%c1_53, %c4_54, %c0_55] : memref<2x20x128xf32, #tpu.memory_space<vmem>>, vector<1x4x127xf32>
    %60 = vector.shape_cast %59 : vector<1x4x127xf32> to vector<4x127xf32>
    %61 = vector.shape_cast %58 : vector<4x127xf32> to vector<1x4x127xf32>
    tpu.vector_store %arg7[%c1_53, %c4_54, %c0_55], %61 {strides = array<i32>} : memref<2x20x128xf32, #tpu.memory_space<vmem>>, vector<1x4x127xf32>,
    %62 = vector.extract_strided_slice %52 {offsets = [0, 2], sizes = [4, 126], strides = [1, 1]} : vector<4x128xf32> to vector<4x126xf32>
    %c1_56 = arith.constant 1 : index
    %c8_57 = arith.constant 8 : index
    %c0_58 = arith.constant 0 : index
    %63 = vector.load %arg7[%c1_56, %c8_57, %c0_58] : memref<2x20x128xf32, #tpu.memory_space<vmem>>, vector<1x4x126xf32>
    %64 = vector.shape_cast %63 : vector<1x4x126xf32> to vector<4x126xf32>
    %65 = vector.shape_cast %62 : vector<4x126xf32> to vector<1x4x126xf32>
    tpu.vector_store %arg7[%c1_56, %c8_57, %c0_58], %65 {strides = array<i32>} : memref<2x20x128xf32, #tpu.memory_space<vmem>>, vector<1x4x126xf32>,
    %c1_59 = arith.constant 1 : index
    %c0_60 = arith.constant 0 : index
    %c0_61 = arith.constant 0 : index
    %66 = vector.load %arg7[%c1_59, %c0_60, %c0_61] : memref<2x20x128xf32, #tpu.memory_space<vmem>>, vector<1x12x128xf32>
    %67 = vector.shape_cast %66 : vector<1x12x128xf32> to vector<12x128xf32>
    %cst_62 = arith.constant dense<0.000000e+00> : vector<4x128xf32>
    %68 = tpu.matmul %53, %67, %cst_62 {dimension_numbers = #tpu.dot_dimension_numbers<[1], [0], [0], [1], [0, 0, 1, 1], [], []>} : vector<4x12xf32>, vector<12x128xf32>, vector<4x128xf32> -> vector<4x128xf32>
    %69 = vector.broadcast %54 : vector<4x1xf32> to vector<4x128xf32>
    %70 = arith.addf %68, %69 : vector<4x128xf32>
    %c0_63 = arith.constant 0 : index
    %c0_64 = arith.constant 0 : index
    %71 = vector.load %arg4[%c0_63, %c0_64] : memref<4x20xf32, #tpu.memory_space<vmem>>, vector<4x20xf32>
    %c0_65 = arith.constant 0 : index
    %c0_66 = arith.constant 0 : index
    %72 = vector.load %arg5[%c0_65, %c0_66] : memref<4x1xf32, #tpu.memory_space<vmem>>, vector<4x1xf32>
    %c1_67 = arith.constant 1 : index
    %c0_68 = arith.constant 0 : index
    %c0_69 = arith.constant 0 : index
    %73 = vector.load %arg7[%c1_67, %c0_68, %c0_69] : memref<2x20x128xf32, #tpu.memory_space<vmem>>, vector<1x4x128xf32>
    %74 = vector.shape_cast %73 : vector<1x4x128xf32> to vector<4x128xf32>
    %75 = vector.shape_cast %70 : vector<4x128xf32> to vector<1x4x128xf32>
    tpu.vector_store %arg7[%c1_67, %c0_68, %c0_69], %75 {strides = array<i32>} : memref<2x20x128xf32, #tpu.memory_space<vmem>>, vector<1x4x128xf32>,
    %76 = vector.extract_strided_slice %70 {offsets = [0, 1], sizes = [4, 127], strides = [1, 1]} : vector<4x128xf32> to vector<4x127xf32>
    %c1_70 = arith.constant 1 : index
    %c4_71 = arith.constant 4 : index
    %c0_72 = arith.constant 0 : index
    %77 = vector.load %arg7[%c1_70, %c4_71, %c0_72] : memref<2x20x128xf32, #tpu.memory_space<vmem>>, vector<1x4x127xf32>
    %78 = vector.shape_cast %77 : vector<1x4x127xf32> to vector<4x127xf32>
    %79 = vector.shape_cast %76 : vector<4x127xf32> to vector<1x4x127xf32>
    tpu.vector_store %arg7[%c1_70, %c4_71, %c0_72], %79 {strides = array<i32>} : memref<2x20x128xf32, #tpu.memory_space<vmem>>, vector<1x4x127xf32>,
    %80 = vector.extract_strided_slice %70 {offsets = [0, 2], sizes = [4, 126], strides = [1, 1]} : vector<4x128xf32> to vector<4x126xf32>
    %c1_73 = arith.constant 1 : index
    %c8_74 = arith.constant 8 : index
    %c0_75 = arith.constant 0 : index
    %81 = vector.load %arg7[%c1_73, %c8_74, %c0_75] : memref<2x20x128xf32, #tpu.memory_space<vmem>>, vector<1x4x126xf32>
    %82 = vector.shape_cast %81 : vector<1x4x126xf32> to vector<4x126xf32>
    %83 = vector.shape_cast %80 : vector<4x126xf32> to vector<1x4x126xf32>
    tpu.vector_store %arg7[%c1_73, %c8_74, %c0_75], %83 {strides = array<i32>} : memref<2x20x128xf32, #tpu.memory_space<vmem>>, vector<1x4x126xf32>,
    %84 = vector.extract_strided_slice %70 {offsets = [0, 3], sizes = [4, 125], strides = [1, 1]} : vector<4x128xf32> to vector<4x125xf32>
    %c1_76 = arith.constant 1 : index
    %c12_77 = arith.constant 12 : index
    %c0_78 = arith.constant 0 : index
    %85 = vector.load %arg7[%c1_76, %c12_77, %c0_78] : memref<2x20x128xf32, #tpu.memory_space<vmem>>, vector<1x4x125xf32>
    %86 = vector.shape_cast %85 : vector<1x4x125xf32> to vector<4x125xf32>
    %87 = vector.shape_cast %84 : vector<4x125xf32> to vector<1x4x125xf32>
    tpu.vector_store %arg7[%c1_76, %c12_77, %c0_78], %87 {strides = array<i32>} : memref<2x20x128xf32, #tpu.memory_space<vmem>>, vector<1x4x125xf32>,
    %88 = vector.extract_strided_slice %70 {offsets = [0, 4], sizes = [4, 124], strides = [1, 1]} : vector<4x128xf32> to vector<4x124xf32>
    %c1_79 = arith.constant 1 : index
    %c16_80 = arith.constant 16 : index
    %c0_81 = arith.constant 0 : index
    %89 = vector.load %arg7[%c1_79, %c16_80, %c0_81] : memref<2x20x128xf32, #tpu.memory_space<vmem>>, vector<1x4x124xf32>
    %90 = vector.shape_cast %89 : vector<1x4x124xf32> to vector<4x124xf32>
    %91 = vector.shape_cast %88 : vector<4x124xf32> to vector<1x4x124xf32>
    tpu.vector_store %arg7[%c1_79, %c16_80, %c0_81], %91 {strides = array<i32>} : memref<2x20x128xf32, #tpu.memory_space<vmem>>, vector<1x4x124xf32>,
    %c1_82 = arith.constant 1 : index
    %c0_83 = arith.constant 0 : index
    %c0_84 = arith.constant 0 : index
    %92 = vector.load %arg7[%c1_82, %c0_83, %c0_84] : memref<2x20x128xf32, #tpu.memory_space<vmem>>, vector<1x20x128xf32>
    %93 = vector.shape_cast %92 : vector<1x20x128xf32> to vector<20x128xf32>
    %cst_85 = arith.constant dense<0.000000e+00> : vector<4x128xf32>
    %94 = tpu.matmul %71, %93, %cst_85 {dimension_numbers = #tpu.dot_dimension_numbers<[1], [0], [0], [1], [0, 0, 1, 1], [], []>} : vector<4x20xf32>, vector<20x128xf32>, vector<4x128xf32> -> vector<4x128xf32>
    %95 = vector.broadcast %72 : vector<4x1xf32> to vector<4x128xf32>
    %96 = arith.addf %94, %95 : vector<4x128xf32>
    %c1_86 = arith.constant 1 : index
    %c0_87 = arith.constant 0 : index
    %c0_88 = arith.constant 0 : index
    %97 = vector.load %arg6[%c1_86, %c0_87, %c0_88] : memref<2x4x128xf32, #tpu.memory_space<vmem>>, vector<1x4x128xf32>
    %98 = vector.shape_cast %97 : vector<1x4x128xf32> to vector<4x128xf32>
    %99 = vector.shape_cast %96 : vector<4x128xf32> to vector<1x4x128xf32>
    tpu.vector_store %arg6[%c1_86, %c0_87, %c0_88], %99 {strides = array<i32>} : memref<2x4x128xf32, #tpu.memory_space<vmem>>, vector<1x4x128xf32>,
    return
  }
  func.func @transform_0(%arg0: i32) -> (i32, i32, i32) {
    %c0_i32 = arith.constant 0 : i32
    %c0_i32_0 = arith.constant 0 : i32
    %c0_i32_1 = arith.constant 0 : i32
    return %arg0, %c0_i32, %c0_i32_0 : i32, i32, i32
  }
  func.func @transform_1(%arg0: i32) -> (i32, i32) {
    %c0_i32 = arith.constant 0 : i32
    %c0_i32_0 = arith.constant 0 : i32
    %c0_i32_1 = arith.constant 0 : i32
    return %c0_i32, %c0_i32_0 : i32, i32
  }
  func.func @transform_2(%arg0: i32) -> (i32, i32) {
    %c0_i32 = arith.constant 0 : i32
    %c0_i32_0 = arith.constant 0 : i32
    %c0_i32_1 = arith.constant 0 : i32
    return %c0_i32, %c0_i32_0 : i32, i32
  }
  func.func @transform_3(%arg0: i32) -> (i32, i32) {
    %c0_i32 = arith.constant 0 : i32
    %c0_i32_0 = arith.constant 0 : i32
    %c0_i32_1 = arith.constant 0 : i32
    return %c0_i32, %c0_i32_0 : i32, i32
  }
  func.func @transform_4(%arg0: i32) -> (i32, i32) {
    %c0_i32 = arith.constant 0 : i32
    %c0_i32_0 = arith.constant 0 : i32
    %c0_i32_1 = arith.constant 0 : i32
    return %c0_i32, %c0_i32_0 : i32, i32
  }
  func.func @transform_5(%arg0: i32) -> (i32, i32, i32) {
    %c0_i32 = arith.constant 0 : i32
    %c0_i32_0 = arith.constant 0 : i32
    %c0_i32_1 = arith.constant 0 : i32
    return %arg0, %c0_i32, %c0_i32_0 : i32, i32, i32
  }
}

</mosaic_0001>

<bundles_post_ra>
// kernel: tpu_custom_call.1
= control target key start
LH: loop header
LB: loop body
LE: loop exit
PB: predicated region body
PF: predicated region fallthrough
CT: control target
= control target key end

     0   :  { %10 = vsyncpa [#allocation4], 0  ;;  %s477_s0 = inlined_call_operand.vmem [shape: f32[2,4,128], index: 0, kind: input, shape index: {}]   ;;  %s478_s1 = inlined_call_operand.hbm [shape: f32[4,12], index: 1, kind: input, shape index: {}]   ;;  %s479_s2 = inlined_call_operand.vmem [shape: f32[4,1], index: 2, kind: input, shape index: {}]   ;;  %s480_s3 = inlined_call_operand.hbm [shape: f32[4,20], index: 3, kind: input, shape index: {}]   ;;  %s481_s4 = inlined_call_operand.vmem [shape: f32[4,1], index: 4, kind: input, shape index: {}]   ;;  %s482_s5 = inlined_call_operand.hbm [shape: f32[2,4,128], index: 5, kind: output, shape index: {}]  }
   0x1   :  { %11 = vsyncpa [#allocation7], 0 }
   0x2   :  { %12 = vsyncpa [#allocation5], 0  ;;  %s20_s20 = sshll.u32 %s478_s1, 4  ;;  %s387_s21 = smov [#allocation3]   ;;  %s21_s20 = int_to_ptr.hbm [resolvable:$true] %s20_s20 }
   0x3   :  { %s22_s22 = sshll.u32 %s387_s21, 4  ;;  %s33_s25 = sshll.u32 %s480_s3, 4  ;;  %s23_s22 = int_to_ptr.vmem [resolvable:$true] %s22_s22  ;;  %s34_s25 = int_to_ptr.hbm [resolvable:$true] %s33_s25 }
   0x4   :  { %25 = dma.hbm_to_vmem [thread:$0]  %s21_s20, 64, %s23_s22, [#allocation4]  }
   0x5   :  { %s388_s26 = smov [#allocation6]  }
   0x6   :  { %s35_s27 = sshll.u32 %s388_s26, 4  ;;  %s36_s27 = int_to_ptr.vmem [resolvable:$true] %s35_s27 }
   0x7   :  { %38 = dma.hbm_to_vmem [thread:$0]  %s34_s25, 64, %s36_s27, [#allocation7]  }
   0x8   :  { %381 = dma.done.wait [#allocation4], 64  }
   0x9   :  { %382 = vsyncadd [#allocation4], 4294967232 }
   0xa   :  { %383 = dma.done.wait [#allocation7], 64  }
   0xb   :  { %384 = vsyncadd [#allocation7], 4294967232  ;;  %v389_v0 = vmov 0.0   ;;  %v291_v1 = vld [vmem:[%s477_s0 + $0x4] sm:$0xf]  ;;  %s390_s30 = smov 126  }
   0xc   :  { %52 = vst [vmem:[#allocation2 + $0x18] sm:$0xff] %v389_v0  ;;  %v55_v2 = vld [vmem:[%s477_s0] sm:$0xf]  ;;  %174 = vrot.lane.b32.xlu0 %v291_v1, %s390_s30  ;;  %s391_s6 = smov 127   ;;  %v392_v4 = vmov 0   ;;  %vm68_vm0 = vcmask 1027072  }
   0xd   :  { %49 = vst [vmem:[#allocation2] sm:$0xff] %v389_v0  ;;  %65 = vrot.lane.b32.xlu1 %v55_v2, %s390_s30  ;;  %v166_v3 = vld [vmem:[%s479_s2] sm:$0xf]  ;;  %307 = vset.pattern.permute.xlu2 %v392_v4  ;;  %vm63_vm1 = vcmask 1035264   ;;  %vm81_vm2 = vcmask 1043456   ;;  %vm77_vm3 = vcmask 97280  }
   0xe   :  { %50 = vst [vmem:[#allocation2 + $0x8] sm:$0xff] %v389_v0  ;;  %308 = vset.pattern.permute.xlu0 %v392_v4  ;;  %182 = vperm.xlu2 %307, %v166_v3   ;;  %v57_v5 = vld [vmem:[%s479_s2] sm:$0xf]  ;;  %v165_v12 = vld [vmem:[#allocation3] sm:$0xf]  ;;  %s393_s2 = smov 124  }
   0xf   :  { %51 = vst [vmem:[#allocation2 + $0x10] sm:$0xf] %v389_v0  ;;  %v56_v14 = vld [vmem:[#allocation3] sm:$0xf]  ;;  %s394_s10 = smov 125   ;;  %vm120_vm4 = vcmask 1018880  }
  0x10   :  { %53 = vst [vmem:[#allocation2 + $0x20] sm:$0xff] %v389_v0  ;;  %v106_v22 = vld [vmem:[%s481_s4] sm:$0xf]  ;;  %vm125_vm5 = vcmask 1010688   ;;  %vm135_vm6 = vcmask 162816   ;;  %s273_s18 = sshll.u32 %s482_s5, 4  ;;  %s274_s18 = int_to_ptr.hbm [resolvable:$true] %s273_s18 }
  0x11   :  { %54 = vst [vmem:[#allocation2 + $0x28] sm:$0xf] %v389_v0  ;;  %v212_v26 = vld [vmem:[%s481_s4] sm:$0xf]  ;;  %v211_v34 = vld [vmem:[#allocation6] sm:$0xf] }
  0x12   :  { %168 = vst [vmem:[#allocation2 + $0x18] sm:$0xf] %v291_v1  ;;  %v105_v38 = vld [vmem:[#allocation6] sm:$0xf]  ;;  %s395_s4 = smov [#allocation8]   ;;  %s396_s19 = smov 64  }
  0x13   :  { %58 = vst [vmem:[#allocation2] sm:$0xf] %v55_v2  ;;  %s271_s15 = sshll.u32 %s395_s4, 4  ;;  %s397_s20 = smov 4   ;;  %s272_s15 = int_to_ptr.vmem [resolvable:$true] %s271_s15 }
  0x14   :  { %170 = vrot.lane.b32.xlu0 %v291_v1, %s391_s6 }
  0x15   :  { %60 = vrot.lane.b32.xlu1 %v55_v2, %s391_s6 }
  0x16   :  { %74 = vperm.xlu2 %307, %v57_v5  }
  0x68   :  { %v183_v16 = vpop.permute.xlu2 %182 }
  0x70   :  { %v75_v17 = vpop.permute.xlu2 %74 }
  0x7e   :  { %v175_v6 = vpop.permute.xlu0 %174 }
  0x7f   :  { %v66_v7 = vpop.permute.xlu1 %65  ;;  %177 = vst.msk [vmem:[#allocation2 + $0x20] sm:$0xf] %vm68_vm0, %v175_v6 }
  0x80   :  { %69 = vst.msk [vmem:[#allocation2 + $0x8] sm:$0xf] %vm68_vm0, %v66_v7 }
  0x86   :  { %v171_v8 = vpop.permute.xlu0 %170  ;;  %v179_v10 = vld [vmem:[#allocation2 + $0x20] sm:$0xf] }
  0x87   :  { %v61_v9 = vpop.permute.xlu1 %60  ;;  %173 = vst.msk [vmem:[#allocation2 + $0x1c] sm:$0xf] %vm63_vm1, %v171_v8  ;;  %292 = vmatpush.msk.msra.mxu2 %vm81_vm2, %v179_v10  ;;  %v71_v11 = vld [vmem:[#allocation2 + $0x8] sm:$0xf] }
  0x88   :  { %64 = vst.msk [vmem:[#allocation2 + $0x4] sm:$0xf] %vm63_vm1, %v61_v9  ;;  %287 = vmatpush.msk.msra.mxu0 %vm81_vm2, %v71_v11 }
  0x8e   :  { %v178_v13 = vld [vmem:[#allocation2 + $0x18] sm:$0xff] }
  0x8f   :  { %v70_v15 = vld [vmem:[#allocation2] sm:$0xff]  ;;  %206 = vmatpush.msra.mxu2 %v178_v13 }
  0x90   :  { %100 = vmatpush.msra.mxu0 %v70_v15  ;;  %293 = vmatmul.msk.f32.vlgmr.msra.gmra.mxu2 %vm77_vm3, %v165_v12 }
  0x91   :  { %288 = vmatmul.msk.f32.vlgmr.msra.gmra.mxu0 %vm77_vm3, %v56_v14 }
 0x10e   :  { %v102_v18 = vpop.f32.mrf.mxu0 }
 0x10f   :  { %v103_v19 = vadd.f32 %v102_v18, %v75_v17 }
 0x111   :  { %107 = vst [vmem:[#allocation2] sm:$0xf] %v103_v19  ;;  %122 = vrot.lane.b32.xlu1 %v103_v19, %s393_s2 }
 0x113   :  { %v208_v20 = vpop.f32.mrf.mxu2 }
 0x114   :  { %v209_v21 = vadd.f32 %v208_v20, %v183_v16 }
 0x116   :  { %213 = vst [vmem:[#allocation2 + $0x18] sm:$0xf] %v209_v21  ;;  %223 = vrot.lane.b32.xlu2 %v209_v21, %s394_s10  ;;  %227 = vrot.lane.b32.xlu0 %v209_v21, %s393_s2 }
 0x119   :  { %219 = vrot.lane.b32.xlu1 %v209_v21, %s390_s30 }
 0x11e   :  { %215 = vrot.lane.b32.xlu0 %v209_v21, %s391_s6  ;;  %113 = vrot.lane.b32.xlu2 %v103_v19, %s390_s30 }
 0x121   :  { %109 = vrot.lane.b32.xlu1 %v103_v19, %s391_s6 }
 0x126   :  { %117 = vrot.lane.b32.xlu0 %v103_v19, %s394_s10  ;;  %132 = vperm.xlu2 %307, %v106_v22  }
 0x12e   :  { %236 = vperm.xlu0 %308, %v212_v26  }
 0x170   :  { %v224_v23 = vpop.permute.xlu2 %223 }
 0x171   :  { %226 = vst.msk [vmem:[#allocation2 + $0x24] sm:$0xf] %vm120_vm4, %v224_v23 }
 0x178   :  { %v114_v24 = vpop.permute.xlu2 %113 }
 0x179   :  { %116 = vst.msk [vmem:[#allocation2 + $0x8] sm:$0xf] %vm68_vm0, %v114_v24 }
 0x180   :  { %v133_v43 = vpop.permute.xlu2 %132 }
 0x183   :  { %v123_v25 = vpop.permute.xlu1 %122 }
 0x184   :  { %126 = vst.msk [vmem:[#allocation2 + $0x10] sm:$0xf] %vm125_vm5, %v123_v25 }
 0x188   :  { %v228_v27 = vpop.permute.xlu0 %227 }
 0x189   :  { %230 = vst.msk [vmem:[#allocation2 + $0x28] sm:$0xf] %vm125_vm5, %v228_v27 }
 0x18b   :  { %v220_v28 = vpop.permute.xlu1 %219  ;;  %v129_v29 = vld [vmem:[#allocation2 + $0x10] sm:$0xf] }
 0x18c   :  { %222 = vst.msk [vmem:[#allocation2 + $0x20] sm:$0xf] %vm68_vm0, %v220_v28  ;;  %289 = vmatpush.msk.msra.mxu1 %vm81_vm2, %v129_v29 }
 0x190   :  { %v216_v30 = vpop.permute.xlu0 %215  ;;  %v233_v31 = vld [vmem:[#allocation2 + $0x28] sm:$0xf] }
 0x191   :  { %218 = vst.msk [vmem:[#allocation2 + $0x1c] sm:$0xf] %vm63_vm1, %v216_v30  ;;  %294 = vmatpush.msk.msra.mxu3 %vm81_vm2, %v233_v31 }
 0x193   :  { %v110_v32 = vpop.permute.xlu1 %109  ;;  %v232_v33 = vld [vmem:[#allocation2 + $0x20] sm:$0xff] }
 0x194   :  { %112 = vst.msk [vmem:[#allocation2 + $0x4] sm:$0xf] %vm63_vm1, %v110_v32  ;;  %259 = vmatpush.msra.mxu3 %v232_v33 }
 0x198   :  { %v118_v35 = vpop.permute.xlu0 %117  ;;  %v231_v36 = vld [vmem:[#allocation2 + $0x18] sm:$0xff] }
 0x199   :  { %121 = vst.msk [vmem:[#allocation2 + $0xc] sm:$0xf] %vm120_vm4, %v118_v35  ;;  %260 = vmatpush.msra.mxu3 %v231_v36 }
 0x19a   :  { %295 = vmatmul.msk.f32.vlgmr.msra.gmra.mxu3 %vm135_vm6, %v211_v34 }
 0x19b   :  { %v127_v39 = vld [vmem:[#allocation2] sm:$0xff] }
 0x1a0   :  { %v128_v37 = vld [vmem:[#allocation2 + $0x8] sm:$0xff]  ;;  %v237_v40 = vpop.permute.xlu0 %236 }
 0x1a1   :  { %156 = vmatpush.msra.mxu1 %v128_v37 }
 0x1a3   :  { %157 = vmatpush.msra.mxu1 %v127_v39 }
 0x1a4   :  { %290 = vmatmul.msk.f32.vlgmr.msra.gmra.mxu1 %vm135_vm6, %v105_v38 }
 0x21d   :  { %v262_v41 = vpop.f32.mrf.mxu3 }
 0x21e   :  { %v263_v42 = vadd.f32 %v262_v41, %v237_v40 }
 0x220   :  { %266 = vst [vmem:[#allocation8 + $0x4] sm:$0xf] %v263_v42 }
 0x221   :  { %v159_v44 = vpop.f32.mrf.mxu1 }
 0x222   :  { %v160_v45 = vadd.f32 %v159_v44, %v133_v43 }
 0x224   :  { %162 = vst [vmem:[#allocation8] sm:$0xf] %v160_v45 }
 0x225   :  { %279 = dma.vmem_to_hbm [thread:$0]  %s272_s15, 128, %s274_s18, [#allocation5], %s396_s19, %s396_s19, %s397_s20  }
 0x226   :  { %385 = dma.done.wait [#allocation5], 128  }
 0x227   :  { %386 = vsyncadd [#allocation5], 4294967168 }
 0x228   :  { %284 = vsyncpa [#allocation4], 1 }
 0x229   :  { %285 = vsyncpa [#allocation7], 1 }
 0x22a   :  { %286 = vsyncpa [#allocation5], 1 }

</bundles_post_ra>
